<compile_context>
chip_gen: v7x
topology: tpu7x:2x2x1
jax: 0.10.0
libtpu: 0.0.40
codegen_flags: <defaults>
</compile_context>

<pallas_src>
import functools
import math

import jax
import jax.numpy as jnp
from jax import lax
from jax.experimental import pallas as pl
from jax.experimental.pallas import tpu as pltpu


def _round_up(x: int, m: int) -> int:
    return (x + m - 1) // m * m


def _tpu_params():
    """(physical VMEM bytes, break-even row-tile constant) for this chip."""
    kind = ""
    try:
        kind = jax.devices()[0].device_kind.lower()
    except Exception:
        pass
    phys = None
    try:
        phys = int(pltpu.get_tpu_info().vmem_capacity_bytes)
    except Exception:
        phys = None
    if phys is None:
        # Conservative default: v7x-sized per-TensorCore VMEM.
        phys = 64 * 1024 * 1024 if ("v7" in kind or not kind) else 128 * 1024 * 1024
    if "v7" in kind:
        k = 320
    elif "v6" in kind:
        k = 640
    elif "v5" in kind:
        k = 256
    else:
        k = 512
    return phys, k


def _footprint(bm, bn, bp, D, itemsize):
    inp = 2 * (bm + bn) * D * itemsize          # double-buffered im/s tiles
    diag = 2 * bm * 4 + bp * 4                  # (bm,1) dbl-buffered + resident (1,bp)
    temps = 3 * bm * bn * 4                     # scores / cost_s / cost_im (f32)
    scratch = bm * 4
    outs = 2 * (8 * 128 * 4) + 2 * bp * 4
    return inp + diag + temps + scratch + outs


def _select_tiles(B, D, itemsize, phys_vmem, k_rows):
    budget = int(phys_vmem * 0.6)
    # Single-tile fast path for small batches.
    if B <= 1024 and _footprint(B, B, B, D, itemsize) <= budget:
        return B, B, B
    bn = 256
    best = None
    hi = min(2048, _round_up(B, 256))
    for bm in range(256, hi + 1, 256):
        bp = _round_up(B, bm)
        if _footprint(bm, bn, bp, D, itemsize) > budget:
            continue
        # time ~ compute (bp^2) * (1 + k/bm) where k ~ HBM/MXU break-even rows
        cost = float(bp) * float(bp) * (1.0 + float(k_rows) / float(bm))
        if best is None or cost <= best[0]:
            best = (cost, bm, bp)
    if best is None:
        bm, bn = 256, 128
        return bm, bn, _round_up(B, 256)
    _, bm, bp = best
    return bm, bn, bp


def _contrastive_kernel(
    im_ref,        # (bm, D)   image rows for this row tile
    s_ref,         # (bn, D)   sentence rows for this column tile
    diag_r_ref,    # (bm, 1)   diag entries, row layout
    diag_c_ref,    # (1, bp)   diag entries, column layout (fully resident)
    out_row_ref,   # (8, 128)  per-row-tile scalar partial (broadcast)
    *rest,         # [out_col_ref (1, bp)] (max mode only), acc_ref (bm,1) VMEM
    margin: float,
    max_violation: bool,
    padded: bool,
    valid_b: int,
    block_m: int,
    block_n: int,
    bp: int,
):
    if max_violation:
        out_col_ref, acc_ref = rest
    else:
        (acc_ref,) = rest

    i = pl.program_id(0)
    j = pl.program_id(1)
    nj = pl.num_programs(1)

    # scores[r, c] = <im_r, s_c>  -- NT contraction straight into the MXU.
    scores = lax.dot_general(
        im_ref[...],
        s_ref[...],
        dimension_numbers=(((1,), (1,)), ((), ())),
        preferred_element_type=jnp.float32,
    )  # (bm, bn) f32

    d_row = diag_r_ref[...]                              # (bm, 1)
    if block_n == bp:
        d_col = diag_c_ref[...]                          # (1, bn)
    else:
        col_start = pl.multiple_of(j * block_n, block_n)
        d_col = diag_c_ref[:, pl.ds(col_start, block_n)]

    cost_s = jnp.maximum(margin + scores - d_row, 0.0)   # caption retrieval
    cost_im = jnp.maximum(margin + scores - d_col, 0.0)  # image retrieval

    # Does this tile touch the global diagonal or the zero-padded tail?
    row_lo = i * block_m
    col_lo = j * block_n
    needs_mask = jnp.logical_and(row_lo < col_lo + block_n,
                                 col_lo < row_lo + block_m)
    if padded:
        needs_mask = (needs_mask
                      | (row_lo + block_m > valid_b)
                      | (col_lo + block_n > valid_b))

    def kill_mask():
        row_ids = row_lo + lax.broadcasted_iota(jnp.int32, scores.shape, 0)
        col_ids = col_lo + lax.broadcasted_iota(jnp.int32, scores.shape, 1)
        kill = row_ids == col_ids
        if padded:
            kill = kill | (row_ids >= valid_b) | (col_ids >= valid_b)
        return kill

    if not max_violation:
        @pl.when(j == 0)
        def _init():
            acc_ref[...] = jnp.zeros_like(acc_ref)

        acc_ref[...] += jnp.sum(cost_s + cost_im, axis=1, keepdims=True)

        # Boundary tiles only: subtract diagonal / padded contributions.
        @pl.when(needs_mask)
        def _correct():
            kill = kill_mask()
            corr = jnp.sum(jnp.where(kill, 0.0, 0.0) + jnp.where(kill, cost_s + cost_im, 0.0),
                           axis=1, keepdims=True)
            acc_ref[...] -= corr

        @pl.when(j == nj - 1)
        def _emit():
            out_row_ref[...] = jnp.broadcast_to(jnp.sum(acc_ref[...]),
                                                out_row_ref.shape)
    else:
        # Hardest-negative mode. Hinge values are >= 0, so 0 is a valid
        # identity and matches the reference's masked-to-zero diagonal.
        @pl.when(j == 0)
        def _init():
            acc_ref[...] = jnp.zeros_like(acc_ref)   # running per-row max

        def update(cs, ci):
            acc_ref[...] = jnp.maximum(
                acc_ref[...], jnp.max(cs, axis=1, keepdims=True))
            col_max = jnp.max(ci, axis=0, keepdims=True)   # (1, bn)
            if block_n == bp:
                out_col_ref[...] = col_max
            else:
                cs_off = pl.multiple_of(j * block_n, block_n)
                out_col_ref[:, pl.ds(cs_off, block_n)] = col_max

        @pl.when(needs_mask)
        def _masked():
            kill = kill_mask()
            update(jnp.where(kill, 0.0, cost_s), jnp.where(kill, 0.0, cost_im))

        @pl.when(jnp.logical_not(needs_mask))
        def _plain():
            update(cost_s, cost_im)

        @pl.when(j == nj - 1)
        def _emit():
            out_row_ref[...] = jnp.broadcast_to(jnp.sum(acc_ref[...]),
                                                out_row_ref.shape)


def contrastive_loss(im, s, margin=0.0, max_violation=False, *,
                     compute_in_bf16=False, tile_m=None, tile_n=None):
    """JAX/Pallas equivalent of ContrastiveLoss(margin, 'cosine', max_violation)."""
    assert im.ndim == 2 and im.shape == s.shape, (im.shape, s.shape)
    B, D = im.shape
    margin = float(margin)
    max_violation = bool(max_violation)

    if compute_in_bf16 or (im.dtype == jnp.bfloat16 and s.dtype == jnp.bfloat16):
        compute_dtype = jnp.bfloat16
    else:
        compute_dtype = jnp.float32
    im = im.astype(compute_dtype)
    s = s.astype(compute_dtype)
    itemsize = jnp.dtype(compute_dtype).itemsize

    phys_vmem, k_rows = _tpu_params()

    if tile_m is not None or tile_n is not None:
        assert tile_m is not None and tile_n is not None
        bm, bn = int(tile_m), int(tile_n)
        assert bm % 128 == 0 and bn % 128 == 0, (bm, bn)
        lcm = bm * bn // math.gcd(bm, bn)
        bp = _round_up(B, lcm)
    else:
        bm, bn, bp = _select_tiles(B, D, itemsize, phys_vmem, k_rows)

    # diag[i] = <im_i, s_i>: row-wise dot (f32), decoupled from the tiled
    # [B,B] score matrix so the kernel can stream score tiles.
    diag = jnp.sum(im.astype(jnp.float32) * s.astype(jnp.float32), axis=1)

    pad = bp - B
    if pad:
        im = jnp.pad(im, ((0, pad), (0, 0)))
        s = jnp.pad(s, ((0, pad), (0, 0)))
        diag = jnp.pad(diag, (0, pad))

    diag_rows = diag.reshape(bp, 1)
    diag_cols = diag.reshape(1, bp)

    ni = bp // bm
    nj = bp // bn

    kernel = functools.partial(
        _contrastive_kernel,
        margin=margin,
        max_violation=max_violation,
        padded=pad > 0,
        valid_b=B,
        block_m=bm,
        block_n=bn,
        bp=bp,
    )

    out_row_shape = jax.ShapeDtypeStruct((ni, 8, 128), jnp.float32)
    out_row_spec = pl.BlockSpec((None, 8, 128), lambda i, j: (i, 0, 0))
    if max_violation:
        out_shape = (out_row_shape,
                     jax.ShapeDtypeStruct((ni, 1, bp), jnp.float32))
        out_specs = (out_row_spec,
                     pl.BlockSpec((None, 1, bp), lambda i, j: (i, 0, 0)))
    else:
        out_shape = out_row_shape
        out_specs = out_row_spec

    grid_spec = pltpu.PrefetchScalarGridSpec(
        num_scalar_prefetch=0,
        grid=(ni, nj),
        in_specs=[
            pl.BlockSpec((bm, D), lambda i, j: (i, 0)),   # im rows (resident over j)
            pl.BlockSpec((bn, D), lambda i, j: (j, 0)),   # s rows (score cols)
            pl.BlockSpec((bm, 1), lambda i, j: (i, 0)),   # diag, row layout
            pl.BlockSpec((1, bp), lambda i, j: (0, 0)),   # diag, column layout (resident)
        ],
        out_specs=out_specs,
        scratch_shapes=[pltpu.VMEM((bm, 1), jnp.float32)],  # row sum / row max
    )

    vmem_limit = min(int(phys_vmem * 0.85), phys_vmem - (4 << 20))
    result = pl.pallas_call(
        kernel,
        out_shape=out_shape,
        grid_spec=grid_spec,
        compiler_params=pltpu.CompilerParams(
            dimension_semantics=("parallel", "arbitrary"),
            vmem_limit_bytes=vmem_limit,
        ),
    )(im, s, diag_rows, diag_cols)

    if max_violation:
        row_parts, col_parts = result
        loss = (jnp.sum(row_parts[:, 0, 0])
                + jnp.sum(jnp.max(col_parts[:, 0, :], axis=0)))
    else:
        loss = jnp.sum(result[:, 0, 0])
    return loss


def _reference_loss(im, s, margin=0.0, max_violation=False):
    # pure-JAX reference mirroring the PyTorch module
    scores = im.astype(jnp.float32) @ s.astype(jnp.float32).T
    diag = jnp.diag(scores).reshape(-1, 1)
    cost_s = jnp.maximum(margin + scores - diag, 0.0)
    cost_im = jnp.maximum(margin + scores - diag.T, 0.0)
    eye = jnp.eye(scores.shape[0], dtype=bool)
    cost_s = jnp.where(eye, 0.0, cost_s)
    cost_im = jnp.where(eye, 0.0, cost_im)
    if max_violation:
        cost_s = cost_s.max(axis=1)
        cost_im = cost_im.max(axis=0)
    return cost_s.sum() + cost_im.sum()


if __name__ == "__main__":
    # NOTE: these toy sizes are launch-overhead bound; the tiled kernel is
    # meant for production batches (hundreds to thousands of embeddings).
    key = jax.random.PRNGKey(0)
    k_im, k_s = jax.random.split(key)

    # Case 1: small single-tile case (B=8 image/sentence pairs, hidden dim 32).
    B, D = 8, 32
    im = jax.random.normal(k_im, (B, D), dtype=jnp.float32)
    s = jax.random.normal(k_s, (B, D), dtype=jnp.float32)
    for margin, mv in [(0.0, False), (0.2, False), (0.2, True)]:
        loss = contrastive_loss(im, s, margin=margin, max_violation=mv)
        jax.block_until_ready(loss)
        ref = _reference_loss(im, s, margin=margin, max_violation=mv)
        assert jnp.allclose(loss, ref, rtol=1e-4, atol=1e-3), (margin, mv, loss, ref)

    # Case 2: forced multi-tile + padding: exercises the 2-D grid, the guarded
    # diagonal/pad correction and the per-row-tile column-max output.
    B2, D2 = 160, 32
    im2 = jax.random.normal(jax.random.PRNGKey(1), (B2, D2), dtype=jnp.float32)
    s2 = jax.random.normal(jax.random.PRNGKey(2), (B2, D2), dtype=jnp.float32)
    for margin, mv in [(0.1, False), (0.1, True)]:
        loss = contrastive_loss(im2, s2, margin=margin, max_violation=mv,
                                tile_m=128, tile_n=128)
        jax.block_until_ready(loss)
        ref = _reference_loss(im2, s2, margin=margin, max_violation=mv)
        assert jnp.allclose(loss, ref, rtol=1e-4, atol=1e-2), (margin, mv, loss, ref)

    # Case 3: bf16 compute path for f32 inputs (compare against the reference
    # on bf16-cast inputs; remaining delta is matmul accumulation order only).
    loss_bf16 = contrastive_loss(im2, s2, margin=0.1, max_violation=True,
                                 compute_in_bf16=True, tile_m=128, tile_n=128)
    jax.block_until_ready(loss_bf16)
    ref_bf16 = _reference_loss(im2.astype(jnp.bfloat16), s2.astype(jnp.bfloat16),
                               margin=0.1, max_violation=True)
    assert jnp.allclose(loss_bf16, ref_bf16, rtol=5e-3, atol=1e-1), (loss_bf16, ref_bf16)

    print("KERNEL_OK")
</pallas_src>

<mosaic_0001>
module attributes {stable_mosaic.version = 11 : i64} {
  func.func @_contrastive_kernel(%arg0: i32, %arg1: i32, %arg2: memref<8x32xf32, #tpu.memory_space<vmem>>, %arg3: memref<8x32xf32, #tpu.memory_space<vmem>>, %arg4: memref<8x1xf32, #tpu.memory_space<vmem>>, %arg5: memref<1x8xf32, #tpu.memory_space<vmem>>, %arg6: memref<1x8x128xf32, #tpu.memory_space<vmem>>, %arg7: memref<8x1xf32, #tpu.memory_space<vmem>>) attributes {dimension_semantics = [#tpu.dimension_semantics<parallel>, #tpu.dimension_semantics<arbitrary>], iteration_bounds = array<i64: 1, 1>, scalar_prefetch = 0 : i64, scratch_operands = 1 : i64, tpu.core_type = #tpu.core_type<tc>, window_params = [{transform_indices = @transform_0, window_bounds = array<i64: 8, 32>}, {transform_indices = @transform_1, window_bounds = array<i64: 8, 32>}, {transform_indices = @transform_2, window_bounds = array<i64: 8, 1>}, {pipeline_mode = #tpu.pipeline_mode<synchronous>, transform_indices = @transform_3, window_bounds = array<i64: 1, 8>}, {transform_indices = @transform_4, window_bounds = array<i64: 1, 8, 128>}]} {
    %c0 = arith.constant 0 : index
    %c0_0 = arith.constant 0 : index
    %0 = vector.load %arg2[%c0, %c0_0] : memref<8x32xf32, #tpu.memory_space<vmem>>, vector<8x32xf32>
    %c0_1 = arith.constant 0 : index
    %c0_2 = arith.constant 0 : index
    %1 = vector.load %arg3[%c0_1, %c0_2] : memref<8x32xf32, #tpu.memory_space<vmem>>, vector<8x32xf32>
    %cst = arith.constant dense<0.000000e+00> : vector<8x8xf32>
    %2 = tpu.matmul %0, %1, %cst {dimension_numbers = #tpu.dot_dimension_numbers<[1], [1], [0], [0], [0, 0, 1, 0], [], []>} : vector<8x32xf32>, vector<8x32xf32>, vector<8x8xf32> -> vector<8x8xf32>
    %c0_3 = arith.constant 0 : index
    %c0_4 = arith.constant 0 : index
    %3 = vector.load %arg4[%c0_3, %c0_4] : memref<8x1xf32, #tpu.memory_space<vmem>>, vector<8x1xf32>
    %c0_5 = arith.constant 0 : index
    %c0_6 = arith.constant 0 : index
    %4 = vector.load %arg5[%c0_5, %c0_6] : memref<1x8xf32, #tpu.memory_space<vmem>>, vector<1x8xf32>
    %cst_7 = arith.constant 0.000000e+00 : f32
    %5 = vector.broadcast %cst_7 : f32 to vector<8x8xf32>
    %6 = arith.addf %5, %2 : vector<8x8xf32>
    %7 = vector.broadcast %3 : vector<8x1xf32> to vector<8x8xf32>
    %8 = arith.subf %6, %7 : vector<8x8xf32>
    %cst_8 = arith.constant 0.000000e+00 : f32
    %9 = vector.broadcast %cst_8 : f32 to vector<8x8xf32>
    %10 = arith.maximumf %8, %9 : vector<8x8xf32>
    %cst_9 = arith.constant 0.000000e+00 : f32
    %11 = vector.broadcast %cst_9 : f32 to vector<8x8xf32>
    %12 = arith.addf %11, %2 : vector<8x8xf32>
    %13 = vector.broadcast %4 : vector<1x8xf32> to vector<8x8xf32>
    %14 = arith.subf %12, %13 : vector<8x8xf32>
    %cst_10 = arith.constant 0.000000e+00 : f32
    %15 = vector.broadcast %cst_10 : f32 to vector<8x8xf32>
    %16 = arith.maximumf %14, %15 : vector<8x8xf32>
    %c8_i32 = arith.constant 8 : i32
    %17 = arith.muli %arg0, %c8_i32 : i32
    %c8_i32_11 = arith.constant 8 : i32
    %18 = arith.muli %arg1, %c8_i32_11 : i32
    %c8_i32_12 = arith.constant 8 : i32
    %19 = arith.addi %18, %c8_i32_12 : i32
    %20 = arith.cmpi slt, %17, %19 : i32
    %c8_i32_13 = arith.constant 8 : i32
    %21 = arith.addi %17, %c8_i32_13 : i32
    %22 = arith.cmpi slt, %18, %21 : i32
    %23 = arith.andi %20, %22 : i1
    %c0_i32 = arith.constant 0 : i32
    %24 = arith.cmpi eq, %arg1, %c0_i32 : i32
    %25 = arith.extui %24 : i1 to i32
    %c0_i32_14 = arith.constant 0 : i32
    %26 = arith.cmpi ne, %25, %c0_i32_14 : i32
    scf.if %26 {
      %cst_23 = arith.constant 0.000000e+00 : f32
      %38 = vector.broadcast %cst_23 : f32 to vector<8x1xf32>
      %c0_24 = arith.constant 0 : index
      %c0_25 = arith.constant 0 : index
      %39 = vector.load %arg7[%c0_24, %c0_25] : memref<8x1xf32, #tpu.memory_space<vmem>>, vector<8x1xf32>
      tpu.vector_store %arg7[%c0_24, %c0_25], %38 {strides = array<i32>} : memref<8x1xf32, #tpu.memory_space<vmem>>, vector<8x1xf32>,
    } else {
    }
    %c0_15 = arith.constant 0 : index
    %c0_16 = arith.constant 0 : index
    %27 = vector.load %arg7[%c0_15, %c0_16] : memref<8x1xf32, #tpu.memory_space<vmem>>, vector<8x1xf32>
    %28 = arith.addf %10, %16 : vector<8x8xf32>
    %cst_17 = arith.constant dense<0.000000e+00> : vector<8xf32>
    %29 = vector.multi_reduction <add>, %28, %cst_17 [1] : vector<8x8xf32> to vector<8xf32>
    %30 = vector.shape_cast %29 : vector<8xf32> to vector<8x1xf32>
    %31 = arith.addf %27, %30 : vector<8x1xf32>
    %c0_18 = arith.constant 0 : index
    %c0_19 = arith.constant 0 : index
    %32 = vector.load %arg7[%c0_18, %c0_19] : memref<8x1xf32, #tpu.memory_space<vmem>>, vector<8x1xf32>
    tpu.vector_store %arg7[%c0_18, %c0_19], %31 {strides = array<i32>} : memref<8x1xf32, #tpu.memory_space<vmem>>, vector<8x1xf32>,
    %33 = arith.extui %23 : i1 to i32
    %c0_i32_20 = arith.constant 0 : i32
    %34 = arith.cmpi ne, %33, %c0_i32_20 : i32
    scf.if %34 {
      %38 = tpu.iota {dimensions = array<i32: 0>} : vector<8x8xi32>
      %39 = vector.broadcast %17 : i32 to vector<8x8xi32>
      %40 = arith.addi %39, %38 : vector<8x8xi32>
      %41 = tpu.iota {dimensions = array<i32: 1>} : vector<8x8xi32>
      %42 = vector.broadcast %18 : i32 to vector<8x8xi32>
      %43 = arith.addi %42, %41 : vector<8x8xi32>
      %44 = arith.cmpi eq, %40, %43 : vector<8x8xi32>
      %cst_23 = arith.constant 0.000000e+00 : f32
      %cst_24 = arith.constant 0.000000e+00 : f32
      %45 = vector.broadcast %cst_23 : f32 to vector<8x8xf32>
      %46 = vector.broadcast %cst_24 : f32 to vector<8x8xf32>
      %47 = arith.select %44, %45, %46 : vector<8x8xi1>, vector<8x8xf32>
      %48 = arith.addf %10, %16 : vector<8x8xf32>
      %cst_25 = arith.constant 0.000000e+00 : f32
      %49 = vector.broadcast %cst_25 : f32 to vector<8x8xf32>
      %50 = arith.select %44, %48, %49 : vector<8x8xi1>, vector<8x8xf32>
      %51 = arith.addf %47, %50 : vector<8x8xf32>
      %cst_26 = arith.constant dense<0.000000e+00> : vector<8xf32>
      %52 = vector.multi_reduction <add>, %51, %cst_26 [1] : vector<8x8xf32> to vector<8xf32>
      %53 = vector.shape_cast %52 : vector<8xf32> to vector<8x1xf32>
      %c0_27 = arith.constant 0 : index
      %c0_28 = arith.constant 0 : index
      %54 = vector.load %arg7[%c0_27, %c0_28] : memref<8x1xf32, #tpu.memory_space<vmem>>, vector<8x1xf32>
      %55 = arith.subf %54, %53 : vector<8x1xf32>
      %c0_29 = arith.constant 0 : index
      %c0_30 = arith.constant 0 : index
      %56 = vector.load %arg7[%c0_29, %c0_30] : memref<8x1xf32, #tpu.memory_space<vmem>>, vector<8x1xf32>
      tpu.vector_store %arg7[%c0_29, %c0_30], %55 {strides = array<i32>} : memref<8x1xf32, #tpu.memory_space<vmem>>, vector<8x1xf32>,
    } else {
    }
    %c0_i32_21 = arith.constant 0 : i32
    %35 = arith.cmpi eq, %arg1, %c0_i32_21 : i32
    %36 = arith.extui %35 : i1 to i32
    %c0_i32_22 = arith.constant 0 : i32
    %37 = arith.cmpi ne, %36, %c0_i32_22 : i32
    scf.if %37 {
      %c0_23 = arith.constant 0 : index
      %c0_24 = arith.constant 0 : index
      %38 = vector.load %arg7[%c0_23, %c0_24] : memref<8x1xf32, #tpu.memory_space<vmem>>, vector<8x1xf32>
      %39 = vector.shape_cast %38 : vector<8x1xf32> to vector<1x8x1xf32>
      %cst_25 = arith.constant dense<0.000000e+00> : vector<1xf32>
      %40 = vector.multi_reduction <add>, %39, %cst_25 [1, 2] : vector<1x8x1xf32> to vector<1xf32>
      %41 = vector.shape_cast %40 : vector<1xf32> to vector<1x1x1xf32>
      %42 = vector.extract %41[0, 0, 0] : f32 from vector<1x1x1xf32>
      %43 = vector.broadcast %42 : f32 to vector<8x128xf32>
      %c0_26 = arith.constant 0 : index
      %c0_27 = arith.constant 0 : index
      %c0_28 = arith.constant 0 : index
      %44 = vector.load %arg6[%c0_26, %c0_27, %c0_28] : memref<1x8x128xf32, #tpu.memory_space<vmem>>, vector<1x8x128xf32>
      %45 = vector.shape_cast %44 : vector<1x8x128xf32> to vector<8x128xf32>
      %46 = vector.shape_cast %43 : vector<8x128xf32> to vector<1x8x128xf32>
      tpu.vector_store %arg6[%c0_26, %c0_27, %c0_28], %46 {strides = array<i32>} : memref<1x8x128xf32, #tpu.memory_space<vmem>>, vector<1x8x128xf32>,
    } else {
    }
    return
  }
  func.func @transform_0(%arg0: i32, %arg1: i32) -> (i32, i32) {
    %c0_i32 = arith.constant 0 : i32
    %c0_i32_0 = arith.constant 0 : i32
    return %arg0, %c0_i32 : i32, i32
  }
  func.func @transform_1(%arg0: i32, %arg1: i32) -> (i32, i32) {
    %c0_i32 = arith.constant 0 : i32
    %c0_i32_0 = arith.constant 0 : i32
    return %arg1, %c0_i32 : i32, i32
  }
  func.func @transform_2(%arg0: i32, %arg1: i32) -> (i32, i32) {
    %c0_i32 = arith.constant 0 : i32
    %c0_i32_0 = arith.constant 0 : i32
    return %arg0, %c0_i32 : i32, i32
  }
  func.func @transform_3(%arg0: i32, %arg1: i32) -> (i32, i32) {
    %c0_i32 = arith.constant 0 : i32
    %c0_i32_0 = arith.constant 0 : i32
    %c0_i32_1 = arith.constant 0 : i32
    return %c0_i32, %c0_i32_0 : i32, i32
  }
  func.func @transform_4(%arg0: i32, %arg1: i32) -> (i32, i32, i32) {
    %c0_i32 = arith.constant 0 : i32
    %c0_i32_0 = arith.constant 0 : i32
    %c0_i32_1 = arith.constant 0 : i32
    return %arg0, %c0_i32, %c0_i32_0 : i32, i32, i32
  }
}

</mosaic_0001>

<bundles_post_ra>
// kernel: tpu_custom_call.1
= control target key start
LH: loop header
LB: loop body
LE: loop exit
PB: predicated region body
PF: predicated region fallthrough
CT: control target
= control target key end

     0   :  { %9 = vsyncpa [#allocation4], 0  ;;  %s472_s0 = inlined_call_operand.hbm [shape: f32[8,32], index: 0, kind: input, shape index: {}]   ;;  %s473_s1 = inlined_call_operand.hbm [shape: f32[8,32], index: 1, kind: input, shape index: {}]   ;;  %s474_s2 = inlined_call_operand.hbm [shape: f32[8,1], index: 2, kind: input, shape index: {}]   ;;  %s475_s3 = inlined_call_operand.hbm [shape: f32[1,8], index: 3, kind: input, shape index: {}]   ;;  %s476_s4 = inlined_call_operand.hbm [shape: f32[1,8,128], index: 4, kind: output, shape index: {}]  }
   0x1   :  { %10 = vsyncpa [#allocation7], 0 }
   0x2   :  { %11 = vsyncpa [#allocation10], 0 }
   0x3   :  { %12 = vsyncpa [#allocation5], 0  ;;  %s375_s15 = smov [#allocation6]   ;;  %s376_s17 = smov [#allocation3]  }
   0x4   :  { %s29_s16 = sshll.u32 %s375_s15, 4  ;;  %s19_s18 = sshll.u32 %s376_s17, 4  ;;  %s30_s16 = int_to_ptr.vmem [resolvable:$true] %s29_s16  ;;  %s20_s18 = int_to_ptr.vmem [resolvable:$true] %s19_s18 }
   0x5   :  { %s257_s21 = scalar_lea.hbm %s473_s1, 128 }
   0x6   :  { %p258_p0 = scmp.ne.s32.totalorder %s473_s1, %s257_s21  ;;  %p261_p1 = scmp.lt.u32.totalorder %s257_s21, %s473_s1 }
   0x8   :  { %p263_p2 = pnand %p261_p1, %p258_p0 }
   0xa   :  { %266 = shalt.err (!%p263_p2)
}
   0xb   :  { %s267_s26 = scalar_lea.vmem %s30_s16, 128  ;;  %p272_p4 = scmp.lt.s32.totalorder %s30_s16, %s30_s16 }
   0xc   :  { %p268_p3 = scmp.ne.s32.totalorder %s30_s16, %s267_s26  ;;  %p273_p5 = scmp.lt.s32.totalorder %s267_s26, %s267_s26 }
   0xe   :  { %p274_p6 = por %p273_p5, %p272_p4 }
  0x10   :  { %p275_p7 = pnand %p274_p6, %p268_p3 }
  0x12   :  { %278 = shalt.err (!%p275_p7)
}
  0x13   :  { %32 = dma.hbm_to_vmem [thread:$0]  %s473_s1, 128, %s30_s16, [#allocation7]  }
  0x14   :  { %s279_s5 = scalar_lea.hbm %s472_s0, 128 }
  0x15   :  { %p280_p8 = scmp.ne.s32.totalorder %s472_s0, %s279_s5  ;;  %p283_p9 = scmp.lt.u32.totalorder %s279_s5, %s472_s0 }
  0x17   :  { %p285_p10 = pnand %p283_p9, %p280_p8 }
  0x19   :  { %288 = shalt.err (!%p285_p10)
}
  0x1a   :  { %s289_s10 = scalar_lea.vmem %s20_s18, 128  ;;  %p294_p12 = scmp.lt.s32.totalorder %s20_s18, %s20_s18 }
  0x1b   :  { %p290_p11 = scmp.ne.s32.totalorder %s20_s18, %s289_s10  ;;  %p295_p13 = scmp.lt.s32.totalorder %s289_s10, %s289_s10 }
  0x1d   :  { %p296_p0 = por %p295_p13, %p294_p12 }
  0x1f   :  { %p297_p1 = pnand %p296_p0, %p290_p11 }
  0x21   :  { %300 = shalt.err (!%p297_p1)
}
  0x22   :  { %22 = dma.hbm_to_vmem [thread:$0]  %s472_s0, 128, %s20_s18, [#allocation4]  }
  0x23   :  { %s377_s12 = smov [#allocation8]   ;;  %s378_s14 = smov [#allocation9]  }
  0x24   :  { %s39_s13 = sshll.u32 %s377_s12, 4  ;;  %s49_s15 = sshll.u32 %s378_s14, 4  ;;  %s40_s13 = int_to_ptr.vmem [resolvable:$true] %s39_s13  ;;  %s50_s15 = int_to_ptr.vmem [resolvable:$true] %s49_s15 }
  0x25   :  { %s301_s19 = scalar_lea.hbm %s474_s2, 128 }
  0x26   :  { %p302_p2 = scmp.ne.s32.totalorder %s474_s2, %s301_s19  ;;  %p305_p3 = scmp.lt.u32.totalorder %s301_s19, %s474_s2 }
  0x28   :  { %p307_p4 = pnand %p305_p3, %p302_p2 }
  0x2a   :  { %310 = shalt.err (!%p307_p4)
}
  0x2b   :  { %s311_s0 = scalar_lea.vmem %s40_s13, 128  ;;  %p316_p6 = scmp.lt.s32.totalorder %s40_s13, %s40_s13 }
  0x2c   :  { %p312_p5 = scmp.ne.s32.totalorder %s40_s13, %s311_s0  ;;  %p317_p7 = scmp.lt.s32.totalorder %s311_s0, %s311_s0 }
  0x2e   :  { %p318_p8 = por %p317_p7, %p316_p6 }
  0x30   :  { %p319_p9 = pnand %p318_p8, %p312_p5 }
  0x32   :  { %322 = shalt.err (!%p319_p9)
}
  0x33   :  { %42 = dma.hbm_to_vmem [thread:$0]  %s474_s2, 128, %s40_s13, [#allocation7]  }
  0x34   :  { %s323_s27 = scalar_lea.hbm %s475_s3, 16 }
  0x35   :  { %p324_p10 = scmp.ne.s32.totalorder %s475_s3, %s323_s27  ;;  %p327_p11 = scmp.lt.u32.totalorder %s323_s27, %s475_s3 }
  0x37   :  { %p329_p12 = pnand %p327_p11, %p324_p10 }
  0x39   :  { %332 = shalt.err (!%p329_p12)
}
  0x3a   :  { %s333_s6 = scalar_lea.vmem %s50_s15, 16  ;;  %s337_s7 = scalar_lea.vmem %s50_s15, 32 }
  0x3b   :  { %p334_p13 = scmp.ne.s32.totalorder %s50_s15, %s333_s6  ;;  %p338_p0 = scmp.lt.s32.totalorder %s50_s15, %s50_s15 }
  0x3c   :  { %p339_p1 = scmp.lt.s32.totalorder %s337_s7, %s333_s6 }
  0x3e   :  { %p340_p2 = por %p339_p1, %p338_p0 }
  0x40   :  { %p341_p3 = pnand %p340_p2, %p334_p13 }
  0x42   :  { %344 = shalt.err (!%p341_p3)
}
  0x43   :  { %52 = dma.hbm_to_vmem [thread:$0]  %s475_s3, 16, %s50_s15, [#allocation10]  }
  0x44   :  { %367 = dma.done.wait [#allocation4], 128  }
  0x45   :  { %368 = vsyncadd [#allocation4], 4294967168 }
  0x46   :  { %369 = dma.done.wait [#allocation7], 256  }
  0x47   :  { %370 = vsyncadd [#allocation7], 4294967040 }
  0x48   :  { %371 = dma.done.wait [#allocation10], 16  }
  0x49   :  { %372 = vsyncadd [#allocation10], 4294967280  ;;  %vm173_vm0 = vcmask 7168   ;;  %v379_v0 = vmov 0.0   ;;  %vm380_vm1 = vmmov 0   ;;  %v381_v1 = vmov 0  }
  0x4a   :  { %241 = vmatprep.subr.mxu0 %v379_v0  ;;  %174 = vst.msk [vmem:[#allocation2] sm:$0xff] %vm173_vm0, %v379_v0  ;;  %243 = vmatprep.mubr.msk.f32.mxu0 %vm380_vm1, %v379_v0  ;;  %vm69_vm2 = vcmask 261120   ;;  %v66_v2 = vld [vmem:[#allocation6] sm:$0xff]  ;;  %v67_v3 = vld [vmem:[#allocation8] sm:$0xff]  ;;  %v65_v4 = vld [vmem:[#allocation3] sm:$0xff]  ;;  %v186_v5 = vlaneseq  ;;  %vm177_vm3 = vcmask 64512  }
  0x4b   :  { %256 = vset.pattern.permute.xlu0 %v381_v1  ;;  %242 = vmatpush3.xpose.msk.msra.mxu0 %vm69_vm2, %v66_v2  ;;  %v238_v7 = vld [vmem:[#allocation9] ss:$0 sm:$0xff]  ;;  %s382_s3 = smov [#allocation11]  }
  0x4c   :  { %148 = vperm.xlu0 %256, %v67_v3   ;;  %v187_v9 = vshrl.u32 %v186_v5, 7  ;;  %v191_v10 = vand.u32 127, %v186_v5  ;;  %s225_s9 = sshll.u32 %s382_s3, 4  ;;  %s226_s9 = int_to_ptr.vmem [resolvable:$true] %s225_s9 }
  0x4d   :  { %s345_s1 = scalar_lea.vmem %s226_s9, 128  ;;  %p350_p5 = scmp.lt.s32.totalorder %s226_s9, %s226_s9 }
  0x4e   :  { %244 = vmatmul.mubr.msk.f32.vlgmr.msra.gmra.mrb[0].mxu0 %vm69_vm2, %v65_v4  ;;  %vm194_vm4 = vcmp.eq.s32.totalorder %v187_v9, %v191_v10  ;;  %p346_p4 = scmp.ne.s32.totalorder %s226_s9, %s345_s1  ;;  %p351_p6 = scmp.lt.s32.totalorder %s345_s1, %s345_s1 }
  0x50   :  { %p352_p7 = por %p351_p6, %p350_p5 }
  0x51   :  { %v175_v20 = vld [vmem:[#allocation2] sm:$0xff] }
  0x52   :  { %p353_p8 = pnand %p352_p7, %p346_p4 }
  0xcb   :  { %v149_v6 = vpop.permute.xlu0 %148 }
 0x121   :  { %v142_v8 = vpop.f32.mrb[0].mxu0 }
 0x122   :  { %v151_v11 = vsub.f32 %v142_v8, %v149_v6  ;;  %v159_v12 = vsub.f32 %v142_v8, %v238_v7  ;;  %v245_v13 = vpop.f32.mrb[1].mxu0 }
 0x124   :  { %v152_v14 = vmax.f32 %v151_v11, 0.0  ;;  %v160_v15 = vmax.f32 %v159_v12, 0.0 }
 0x126   :  { %v176_v16 = vadd.f32 %v160_v15, %v152_v14 }
 0x128   :  { %v178_v17 = vsel %vm177_vm3, %v176_v16, 0.0  ;;  %v195_v18 = vsel %vm194_vm4, %v176_v16, 0.0 }
 0x129   :  { %179 = vadd.xlane.f32.xlu0 %v178_v17  ;;  %v197_v19 = vsel %vm177_vm3, %v195_v18, 0.0 }
 0x12a   :  { %198 = vadd.xlane.f32.xlu1 %v197_v19 }
 0x1b6   :  { %v180_v21 = vpop.xlane.xlu0 %179 }
 0x1b7   :  { %v181_v22 = vadd.f32 %v180_v21, %v175_v20  ;;  %v199_v23 = vpop.xlane.xlu1 %198 }
 0x1b9   :  { %183 = vst.msk [vmem:[#allocation2] sm:$0xff] %vm173_vm0, %v181_v22 }
 0x1c0   :  { %v200_v24 = vld [vmem:[#allocation2] sm:$0xff] }
 0x1c1   :  { %v201_v25 = vsub.f32 %v200_v24, %v199_v23 }
 0x1c3   :  { %202 = vst.msk [vmem:[#allocation2] sm:$0xff] %vm173_vm0, %v201_v25 }
 0x1ca   :  { %v206_v26 = vld [vmem:[#allocation2] sm:$0xff] }
 0x1cb   :  { %v207_v27 = vsel %vm173_vm0, %v206_v26, 0.0 }
 0x1cc   :  { %208 = vadd.xlane.f32.xlu1 %v207_v27 }
 0x259   :  { %v209_v28 = vpop.xlane.xlu1 %208 }
 0x25a   :  { %v210_v29 = vrot.slane %v209_v28, 4 }
 0x25c   :  { %v211_v30 = vadd.f32 %v210_v29, %v209_v28 }
 0x25e   :  { %v212_v31 = vrot.slane %v211_v30, 2 }
 0x260   :  { %v213_v32 = vadd.f32 %v212_v31, %v211_v30 }
 0x262   :  { %v214_v33 = vrot.slane %v213_v32, 1 }
 0x264   :  { %v215_v34 = vadd.f32 %v214_v33, %v213_v32 }
 0x266   :  { %246 = vpush %v215_v34 }
 0x297   :  { %s247_s10 = spop %246 }
 0x298   :  { %v217_v35 = vstv %s247_s10 }
 0x299   :  { %218 = vst [vmem:[#allocation11] sm:$0xff] %v217_v35 }
 0x29a   :  { %356 = shalt.err (!%p353_p8)
}
 0x29b   :  { %s357_s13 = scalar_lea.hbm %s476_s4, 128 }
 0x29c   :  { %p358_p9 = scmp.ne.s32.totalorder %s476_s4, %s357_s13  ;;  %p361_p10 = scmp.lt.u32.totalorder %s357_s13, %s476_s4 }
 0x29e   :  { %p363_p11 = pnand %p361_p10, %p358_p9 }
 0x2a0   :  { %366 = shalt.err (!%p363_p11)
}
 0x2a1   :  { %228 = dma.vmem_to_hbm [thread:$0]  %s226_s9, 128, %s476_s4, [#allocation5]  }
 0x2a2   :  { %373 = dma.done.wait [#allocation5], 128  }
 0x2a3   :  { %374 = vsyncadd [#allocation5], 4294967168 }
 0x2a4   :  { %232 = vsyncpa [#allocation4], 1 }
 0x2a5   :  { %233 = vsyncpa [#allocation7], 1 }
 0x2a6   :  { %234 = vsyncpa [#allocation10], 1 }
 0x2a7   :  { %235 = vsyncpa [#allocation5], 1 }

</bundles_post_ra>
